<compile_context>
chip_gen: v5e
topology: v5e:2x2
jax: 0.10.0
libtpu: 0.0.40
codegen_flags: <defaults>
</compile_context>

<pallas_src>
import math

import jax
import jax.numpy as jnp
from jax.experimental import pallas as pl
from jax.experimental.pallas import tpu as pltpu


_LANE = 128                   # lane (last-dim) alignment
_SUBLANE = 8                  # sublane (second-to-last-dim) alignment for f32
_TM_MAX = 2048                # max batch-row tile
_TM_VMEM_BUDGET = 12 << 20    # VMEM budget (bytes) for the row-tiled operands


def _round_up(n: int, m: int) -> int:
    return pl.cdiv(n, m) * m


def _pad2d(a, rows, cols):
    out = jnp.zeros((rows, cols), a.dtype)
    return out.at[: a.shape[0], : a.shape[1]].set(a)


def _mlp_kernel(*refs):
    """refs = (x_ref, w_ref_0, ..., w_ref_{L-1}, o_ref).

    o = (...relu(relu(x @ W0) @ W1)... @ W_{L-1}) computed entirely in-kernel:
    intermediate activations stay in vregs/VMEM and never touch HBM.
    Operands are fed to the MXU in bf16; accumulation stays f32.
    """
    x_ref, *w_refs, o_ref = refs
    h = jnp.dot(x_ref[...].astype(jnp.bfloat16), w_refs[0][...],
                preferred_element_type=jnp.float32)
    for w_ref in w_refs[1:]:
        h = jnp.dot(jnp.maximum(h, 0.0).astype(w_ref.dtype), w_ref[...],
                    preferred_element_type=jnp.float32)
    o_ref[...] = h.astype(o_ref.dtype)


def mlp_fused_pallas(x, weights_t_pad, out_features):
    """Run the whole MLP in a single fused Pallas kernel.

    x:              (M, K) — K is the TRUE first-layer width (no padding).
    weights_t_pad:  list of bf16 (Kp_i, Np_i); Kp_0 == K, Np_i == Kp_{i+1},
                    all padded feature dims are multiples of 128.
    out_features:   true (unpadded) width of the final layer.
    """
    M, K = x.shape
    assert K == weights_t_pad[0].shape[0]
    NLp = weights_t_pad[-1].shape[1]

    # ---- choose the row tile from the VMEM budget -------------------------
    x_isz = jnp.dtype(x.dtype).itemsize
    widest = max([K] + [w.shape[1] for w in weights_t_pad])
    per_row_bytes = (2 * K * x_isz     # x tile, double-buffered
                     + 2 * NLp * 4     # out tile (f32), double-buffered
                     + 2 * widest * 4) # live f32 intermediates
    tm_budget = max(_SUBLANE,
                    (_TM_VMEM_BUDGET // per_row_bytes) // _SUBLANE * _SUBLANE)
    tm = min(_TM_MAX, _round_up(M, _SUBLANE), tm_budget)
    # Keep >= 2 grid steps when M allows it so the "parallel" row axis can
    # shard across both TensorCores on v7x (neutral on single-TC v5e/v6e).
    tm = max(_SUBLANE, min(tm, _round_up(pl.cdiv(M, 2), _SUBLANE)))
    grid = (pl.cdiv(M, tm),)   # ragged grid: no row padding of x or out

    # ---- specs -------------------------------------------------------------
    in_specs = [pl.BlockSpec((tm, K), lambda i: (i, 0))]
    for w in weights_t_pad:
        # Whole weight VMEM-resident; constant index_map -> fetched once.
        # TODO(synk): for wide fused layers, single-buffer these via
        # pipeline_mode=pl.Buffered(1); at these widths (<100 KiB total bf16)
        # the default double-buffering costs negligible VMEM.
        in_specs.append(pl.BlockSpec(w.shape, lambda i: (0, 0)))
    # Output block kept 128-lane wide (unmasked vst); trailing rows of the
    # last block are masked by Pallas, padded lanes sliced off by the caller.
    out_spec = pl.BlockSpec((tm, NLp), lambda i: (i, 0))

    # ---- explicit VMEM limit (default scoped limits are well below physical)
    w_bytes = sum(int(w.size) * 2 for w in weights_t_pad)
    needed = tm * per_row_bytes + 2 * w_bytes + (2 << 20)
    vmem_limit = int(min(max(needed, 32 << 20), 48 << 20))

    flops = 2 * M * sum(w.shape[0] * w.shape[1] for w in weights_t_pad)
    bytes_accessed = int(x.size) * x_isz + w_bytes + M * NLp * 4

    out = pl.pallas_call(
        _mlp_kernel,
        out_shape=jax.ShapeDtypeStruct((M, NLp), jnp.float32),
        grid_spec=pl.GridSpec(grid=grid, in_specs=in_specs, out_specs=out_spec),
        compiler_params=pltpu.CompilerParams(
            dimension_semantics=("parallel",),
            vmem_limit_bytes=vmem_limit,
        ),
        cost_estimate=pl.CostEstimate(
            flops=flops, transcendentals=0, bytes_accessed=bytes_accessed),
    )(x, *weights_t_pad)

    # Lane slice only (rows are already exact); drop if the caller tolerates
    # the padded (M, NLp) buffer.
    return out[:, :out_features]


class MLPPallas:
    """JAX/Pallas re-implementation of the PyTorch MLP module."""

    def __init__(self, n_units, init_scale=1.0, key=None):
        self.n_units = list(n_units)
        if key is None:
            key = jax.random.PRNGKey(0)
        self.weights_t = []       # unpadded f32 (in, out), for the reference
        self.weights_t_pad = []   # padded bf16 weights fed to the kernel
        for i in range(1, len(n_units)):
            fan_in, fan_out = n_units[i - 1], n_units[i]
            variance = math.sqrt(2.0 / (fan_in + fan_out))
            key, sub = jax.random.split(key)
            # PyTorch: weight shape (out, in), normal(0, init_scale * variance)
            w = init_scale * variance * jax.random.normal(
                sub, (fan_out, fan_in), dtype=jnp.float32)
            w_t = jnp.transpose(w)  # (in, out)
            self.weights_t.append(w_t)
            # First layer keeps its TRUE input width (x is not padded);
            # every later input width matches the previous padded output width,
            # so zero rows/cols keep the padded lanes exactly zero through ReLU.
            in_pad = fan_in if i == 1 else _round_up(fan_in, _LANE)
            out_pad = _round_up(fan_out, _LANE)
            self.weights_t_pad.append(
                _pad2d(w_t, in_pad, out_pad).astype(jnp.bfloat16))

    def __call__(self, x):
        # x.view(-1, n_units[0])
        x = jnp.reshape(x, (-1, self.n_units[0]))
        return mlp_fused_pallas(x, self.weights_t_pad, self.n_units[-1])


def mlp_reference(x, weights_t, n0):
    """Pure-JAX reference matching the PyTorch forward, with the same
    bf16-operand / f32-accumulation numerics as the kernel."""
    h = jnp.reshape(x, (-1, n0)).astype(jnp.bfloat16)
    out = jnp.dot(h, weights_t[0].astype(jnp.bfloat16),
                  preferred_element_type=jnp.float32)
    for w_t in weights_t[1:]:
        out = jnp.dot(jnp.maximum(out, 0.0).astype(jnp.bfloat16),
                      w_t.astype(jnp.bfloat16),
                      preferred_element_type=jnp.float32)
    return out


if __name__ == "__main__":
    n_units = [32, 64, 32, 16]
    root = jax.random.PRNGKey(0)
    wkey, xkey = jax.random.split(root)

    model = MLPPallas(n_units, init_scale=1.0, key=wkey)

    # input: (2, 4, 16) -> view(-1, 32) gives 4 rows of 32 features
    x = jax.random.normal(xkey, (2, 4, 16), dtype=jnp.float32)

    out = jax.block_until_ready(model(x))

    ref = mlp_reference(x, model.weights_t, n_units[0])
    assert out.shape == (4, n_units[-1]), out.shape
    assert jnp.allclose(out, ref, atol=1e-2, rtol=1e-2), (
        float(jnp.max(jnp.abs(out - ref))))
    print("KERNEL_OK")
</pallas_src>

<mosaic_0001>
module attributes {stable_mosaic.version = 11 : i64} {
  func.func @_mlp_kernel(%arg0: i32, %arg1: memref<8x32xf32, #tpu.memory_space<vmem>>, %arg2: memref<32x128xbf16, #tpu.memory_space<vmem>>, %arg3: memref<128x128xbf16, #tpu.memory_space<vmem>>, %arg4: memref<128x128xbf16, #tpu.memory_space<vmem>>, %arg5: memref<8x128xf32, #tpu.memory_space<vmem>>) attributes {dimension_semantics = [#tpu.dimension_semantics<parallel>], iteration_bounds = array<i64: 1>, scalar_prefetch = 0 : i64, scratch_operands = 0 : i64, tpu.core_type = #tpu.core_type<tc>, window_params = [{transform_indices = @transform_0, window_bounds = array<i64: 8, 32>}, {pipeline_mode = #tpu.pipeline_mode<synchronous>, transform_indices = @transform_1, window_bounds = array<i64: 32, 128>}, {pipeline_mode = #tpu.pipeline_mode<synchronous>, transform_indices = @transform_2, window_bounds = array<i64: 128, 128>}, {pipeline_mode = #tpu.pipeline_mode<synchronous>, transform_indices = @transform_3, window_bounds = array<i64: 128, 128>}, {transform_indices = @transform_4, window_bounds = array<i64: 8, 128>}]} {
    %c0 = arith.constant 0 : index
    %c0_0 = arith.constant 0 : index
    %0 = vector.load %arg1[%c0, %c0_0] : memref<8x32xf32, #tpu.memory_space<vmem>>, vector<8x32xf32>
    %1 = arith.truncf %0 : vector<8x32xf32> to vector<8x32xbf16>
    %c0_1 = arith.constant 0 : index
    %c0_2 = arith.constant 0 : index
    %2 = vector.load %arg2[%c0_1, %c0_2] : memref<32x128xbf16, #tpu.memory_space<vmem>>, vector<32x128xbf16>
    %cst = arith.constant dense<0.000000e+00> : vector<8x128xf32>
    %3 = tpu.matmul %1, %2, %cst {dimension_numbers = #tpu.dot_dimension_numbers<[1], [0], [0], [1], [0, 0, 1, 1], [], []>} : vector<8x32xbf16>, vector<32x128xbf16>, vector<8x128xf32> -> vector<8x128xf32>
    %cst_3 = arith.constant 0.000000e+00 : f32
    %4 = vector.broadcast %cst_3 : f32 to vector<8x128xf32>
    %5 = arith.maximumf %3, %4 : vector<8x128xf32>
    %6 = arith.truncf %5 : vector<8x128xf32> to vector<8x128xbf16>
    %c0_4 = arith.constant 0 : index
    %c0_5 = arith.constant 0 : index
    %7 = vector.load %arg3[%c0_4, %c0_5] : memref<128x128xbf16, #tpu.memory_space<vmem>>, vector<128x128xbf16>
    %cst_6 = arith.constant dense<0.000000e+00> : vector<8x128xf32>
    %8 = tpu.matmul %6, %7, %cst_6 {dimension_numbers = #tpu.dot_dimension_numbers<[1], [0], [0], [1], [0, 0, 1, 1], [], []>} : vector<8x128xbf16>, vector<128x128xbf16>, vector<8x128xf32> -> vector<8x128xf32>
    %cst_7 = arith.constant 0.000000e+00 : f32
    %9 = vector.broadcast %cst_7 : f32 to vector<8x128xf32>
    %10 = arith.maximumf %8, %9 : vector<8x128xf32>
    %11 = arith.truncf %10 : vector<8x128xf32> to vector<8x128xbf16>
    %c0_8 = arith.constant 0 : index
    %c0_9 = arith.constant 0 : index
    %12 = vector.load %arg4[%c0_8, %c0_9] : memref<128x128xbf16, #tpu.memory_space<vmem>>, vector<128x128xbf16>
    %cst_10 = arith.constant dense<0.000000e+00> : vector<8x128xf32>
    %13 = tpu.matmul %11, %12, %cst_10 {dimension_numbers = #tpu.dot_dimension_numbers<[1], [0], [0], [1], [0, 0, 1, 1], [], []>} : vector<8x128xbf16>, vector<128x128xbf16>, vector<8x128xf32> -> vector<8x128xf32>
    %c0_11 = arith.constant 0 : index
    %c0_12 = arith.constant 0 : index
    %14 = vector.load %arg5[%c0_11, %c0_12] : memref<8x128xf32, #tpu.memory_space<vmem>>, vector<8x128xf32>
    tpu.vector_store %arg5[%c0_11, %c0_12], %13 {strides = array<i32>} : memref<8x128xf32, #tpu.memory_space<vmem>>, vector<8x128xf32>,
    return
  }
  func.func @transform_0(%arg0: i32) -> (i32, i32) {
    %c0_i32 = arith.constant 0 : i32
    %c0_i32_0 = arith.constant 0 : i32
    return %arg0, %c0_i32 : i32, i32
  }
  func.func @transform_1(%arg0: i32) -> (i32, i32) {
    %c0_i32 = arith.constant 0 : i32
    %c0_i32_0 = arith.constant 0 : i32
    %c0_i32_1 = arith.constant 0 : i32
    return %c0_i32, %c0_i32_0 : i32, i32
  }
  func.func @transform_2(%arg0: i32) -> (i32, i32) {
    %c0_i32 = arith.constant 0 : i32
    %c0_i32_0 = arith.constant 0 : i32
    %c0_i32_1 = arith.constant 0 : i32
    return %c0_i32, %c0_i32_0 : i32, i32
  }
  func.func @transform_3(%arg0: i32) -> (i32, i32) {
    %c0_i32 = arith.constant 0 : i32
    %c0_i32_0 = arith.constant 0 : i32
    %c0_i32_1 = arith.constant 0 : i32
    return %c0_i32, %c0_i32_0 : i32, i32
  }
  func.func @transform_4(%arg0: i32) -> (i32, i32) {
    %c0_i32 = arith.constant 0 : i32
    %c0_i32_0 = arith.constant 0 : i32
    return %arg0, %c0_i32 : i32, i32
  }
}

</mosaic_0001>

<bundles_post_ra>
// kernel: tpu_custom_call.1
= control target key start
LH: loop header
LB: loop body
LE: loop exit
PB: predicated region body
PF: predicated region fallthrough
CT: control target
= control target key end

     0   :  { %9 = vsyncpa [#allocation3], 0  ;;  %s585_s0 = inlined_call_operand.hbm [shape: f32[4,32], index: 0, kind: input, shape index: {}]   ;;  %s586_s1 = inlined_call_operand.hbm [shape: bf16[32,128], index: 1, kind: input, shape index: {}]   ;;  %s587_s2 = inlined_call_operand.hbm [shape: bf16[128,128], index: 2, kind: input, shape index: {}]   ;;  %s588_s3 = inlined_call_operand.hbm [shape: bf16[128,128], index: 3, kind: input, shape index: {}]   ;;  %s589_s4 = inlined_call_operand.hbm [shape: f32[4,128], index: 4, kind: output, shape index: {}]  }
   0x1   :  { %10 = vsyncpa [#allocation6], 0 }
   0x2   :  { %11 = vsyncpa [#allocation9], 0 }
   0x3   :  { %12 = vsyncpa [#allocation4], 0 }
   0x4   :  { %16 = vsyncadd [#allocation3], 64  ;;  %s30_s17 = sshll.u32 %s586_s1, 4  ;;  %s523_s18 = smov [#allocation5]   ;;  %s31_s17 = int_to_ptr.hbm [resolvable:$true] %s30_s17 }
   0x5   :  { %s32_s19 = sshll.u32 %s523_s18, 4  ;;  %s17_s22 = sshll.u32 %s585_s0, 4  ;;  %s33_s19 = int_to_ptr.vmem [resolvable:$true] %s32_s19  ;;  %s18_s22 = int_to_ptr.hbm [resolvable:$true] %s17_s22 }
   0x6   :  { %s524_s23 = smov 64   ;;  %s525_s24 = smov 4  }
   0x7   :  { %38 = dma.hbm_to_vmem [thread:$0]  %s31_s17, 256, %s33_s19, [#allocation6], %s524_s23, %s524_s23, %s525_s24  }
   0x8   :  { %s526_s25 = smov [#allocation2]   ;;  %s43_s1 = sshll.u32 %s587_s2, 4  ;;  %s44_s1 = int_to_ptr.hbm [resolvable:$true] %s43_s1 }
   0x9   :  { %s19_s26 = sshll.u32 %s526_s25, 4  ;;  %s56_s30 = sshll.u32 %s588_s3, 4  ;;  %s20_s26 = int_to_ptr.vmem [resolvable:$true] %s19_s26  ;;  %s57_s30 = int_to_ptr.hbm [resolvable:$true] %s56_s30 }
   0xa   :  { %25 = dma.hbm_to_vmem [thread:$0]  %s18_s22, 64, %s20_s26, [#allocation3], %s524_s23, %s524_s23, %s525_s24  }
   0xb   :  { %s527_s5 = smov [#allocation7]   ;;  %s528_s7 = smov [#allocation8]  }
   0xc   :  { %s45_s6 = sshll.u32 %s527_s5, 4  ;;  %s58_s2 = sshll.u32 %s528_s7, 4  ;;  %s46_s6 = int_to_ptr.vmem [resolvable:$true] %s45_s6  ;;  %s59_s2 = int_to_ptr.vmem [resolvable:$true] %s58_s2 }
   0xd   :  { %51 = dma.hbm_to_vmem [thread:$0]  %s44_s1, 1024, %s46_s6, [#allocation6], %s524_s23, %s524_s23, %s525_s24  }
   0xe   :  { %64 = dma.hbm_to_vmem [thread:$0]  %s57_s30, 1024, %s59_s2, [#allocation9], %s524_s23, %s524_s23, %s525_s24  }
   0xf   :  { %515 = dma.done.wait [#allocation3], 128  }
  0x10   :  { %516 = vsyncadd [#allocation3], 4294967168 }
  0x11   :  { %517 = dma.done.wait [#allocation6], 1280  }
  0x12   :  { %518 = vsyncadd [#allocation6], 4294966016 }
  0x13   :  { %519 = dma.done.wait [#allocation9], 1024  }
  0x14   :  { %520 = vsyncadd [#allocation9], 4294966272  ;;  %v371_v0 = vld [vmem:[#allocation5 + $0x8] sm:$0xff]  ;;  %v370_v2 = vld [vmem:[#allocation5] sm:$0xff]  ;;  %vm100_vm0 = vcmask 261120  }
  0x15   :  { %v379_v1 = vld [vmem:[#allocation7 + $0x38] sm:$0xff]  ;;  %110 = vmatpush.bf16.msra.mxu0 %v371_v0  ;;  %v82_v3 = vld [vmem:[#allocation2] sm:$0xff]  ;;  %v378_v4 = vld [vmem:[#allocation7 + $0x30] sm:$0xff] }
  0x16   :  { %183 = vmatpush.bf16.msra.mxu1 %v379_v1  ;;  %v83_v5 = vpack.c.bf16 %v82_v3, %v82_v3  ;;  %v377_v6 = vld [vmem:[#allocation7 + $0x28] sm:$0xff]  ;;  %v376_v7 = vld [vmem:[#allocation7 + $0x20] sm:$0xff]  ;;  %v375_v8 = vld [vmem:[#allocation7 + $0x18] sm:$0xff] }
  0x17   :  { %v374_v9 = vld [vmem:[#allocation7 + $0x10] sm:$0xff]  ;;  %v373_v10 = vld [vmem:[#allocation7 + $0x8] sm:$0xff]  ;;  %v372_v11 = vld [vmem:[#allocation7] sm:$0xff] }
  0x18   :  { %v387_v12 = vld [vmem:[#allocation8 + $0x38] sm:$0xff]  ;;  %v386_v13 = vld [vmem:[#allocation8 + $0x30] sm:$0xff]  ;;  %v385_v14 = vld [vmem:[#allocation8 + $0x28] sm:$0xff] }
  0x19   :  { %111 = vmatpush.bf16.msra.mxu0 %v370_v2  ;;  %262 = vmatpush.bf16.msra.mxu2 %v387_v12  ;;  %v384_v15 = vld [vmem:[#allocation8 + $0x20] sm:$0xff]  ;;  %v383_v16 = vld [vmem:[#allocation8 + $0x18] sm:$0xff]  ;;  %v382_v17 = vld [vmem:[#allocation8 + $0x10] sm:$0xff] }
  0x1a   :  { %184 = vmatpush.bf16.msra.mxu1 %v378_v4  ;;  %v381_v18 = vld [vmem:[#allocation8 + $0x8] sm:$0xff]  ;;  %v380_v23 = vld [vmem:[#allocation8] sm:$0xff] }
  0x1c   :  { %305 = vmatmul.msk.bf16.vlgmr.msra.gmra.mxu0 %vm100_vm0, %v83_v5 }
  0x1d   :  { %263 = vmatpush.bf16.msra.mxu2 %v386_v13 }
  0x1e   :  { %185 = vmatpush.bf16.msra.mxu1 %v377_v6 }
  0x21   :  { %264 = vmatpush.bf16.msra.mxu2 %v385_v14 }
  0x22   :  { %186 = vmatpush.bf16.msra.mxu1 %v376_v7 }
  0x25   :  { %265 = vmatpush.bf16.msra.mxu2 %v384_v15 }
  0x26   :  { %187 = vmatpush.bf16.msra.mxu1 %v375_v8 }
  0x29   :  { %266 = vmatpush.bf16.msra.mxu2 %v383_v16 }
  0x2a   :  { %188 = vmatpush.bf16.msra.mxu1 %v374_v9 }
  0x2d   :  { %267 = vmatpush.bf16.msra.mxu2 %v382_v17 }
  0x2e   :  { %189 = vmatpush.bf16.msra.mxu1 %v373_v10 }
  0x31   :  { %268 = vmatpush.bf16.msra.mxu2 %v381_v18 }
  0x32   :  { %190 = vmatpush.bf16.msra.mxu1 %v372_v11 }
  0x35   :  { %269 = vmatpush.bf16.msra.mxu2 %v380_v23 }
  0x99   :  { %v113_v19 = vpop.f32.mrf.mxu0 }
  0x9a   :  { %v117_v20 = vmax.f32 %v113_v19, 0.0 }
  0x9c   :  { %v118_v21 = vpack.c.bf16 %v117_v20, %v117_v20 }
  0x9e   :  { %191 = vmatmul.bf16.vlgmr.msra.gmra.mxu1 %v118_v21 }
  0xa1   :  { %v115_v22 = vpop.f32.mrf.mxu0 }
 0x11b   :  { %v192_v24 = vpop.f32.mrf.mxu1 }
 0x11c   :  { %v196_v25 = vmax.f32 %v192_v24, 0.0 }
 0x11e   :  { %v197_v26 = vpack.c.bf16 %v196_v25, %v196_v25 }
 0x120   :  { %270 = vmatmul.bf16.vlgmr.msra.gmra.mxu2 %v197_v26 }
 0x123   :  { %v194_v27 = vpop.f32.mrf.mxu1 }
 0x1a3   :  { %v271_v28 = vpop.f32.mrf.mxu2 }
 0x1a4   :  { %275 = vst [vmem:[#allocation10] sm:$0xff] %v271_v28 }
 0x1ab   :  { %v273_v29 = vpop.f32.mrf.mxu2 }
 0x1ac   :  { %279 = vsyncadd [#allocation4], 64  ;;  %s282_s9 = sshll.u32 %s589_s4, 4  ;;  %s529_s10 = smov [#allocation10]   ;;  %s283_s9 = int_to_ptr.hbm [resolvable:$true] %s282_s9 }
 0x1ad   :  { %s280_s11 = sshll.u32 %s529_s10, 4  ;;  %s281_s11 = int_to_ptr.vmem [resolvable:$true] %s280_s11 }
 0x1ae   :  { %288 = dma.vmem_to_hbm [thread:$0]  %s281_s11, 64, %s283_s9, [#allocation4], %s524_s23, %s524_s23, %s525_s24  }
 0x1af   :  { %521 = dma.done.wait [#allocation4], 128  }
 0x1b0   :  { %522 = vsyncadd [#allocation4], 4294967168 }
 0x1b1   :  { %293 = vsyncpa [#allocation3], 1 }
 0x1b2   :  { %294 = vsyncpa [#allocation6], 1 }
 0x1b3   :  { %295 = vsyncpa [#allocation9], 1 }
 0x1b4   :  { %296 = vsyncpa [#allocation4], 1 }

</bundles_post_ra>
